<compile_context>
chip_gen: v7x
topology: tpu7x:2x2x1
jax: 0.10.0
libtpu: 0.0.40
codegen_flags: <defaults>
</compile_context>

<pallas_src>
import functools

import jax
import jax.numpy as jnp
from jax.experimental import pallas as pl
from jax.experimental.pallas import tpu as pltpu


def _conv_block_kernel(x_ref, w_ref, b_ref, o_ref, patch_ref, *,
                       K, Wp, Cin, M, TM, use_activation):
    """One batch element per grid step (transposed / channel-major formulation).

    x_ref:     (1, Cin, S)      bf16  reflection-padded, spatially flattened;
                                      S = Hp*Wp + (K-1) trailing zero taps
    w_ref:     (Cout, K*K*Cin)  bf16  tap-major folded weights
    b_ref:     (Cout, 1)        f32
    o_ref:     (1, Cout, M)     bf16  M = H*Wp (junk width cols sliced by wrapper)
    patch_ref: (K*K*Cin, TM)    bf16  persistent VMEM im2col scratch
    """
    w = w_ref[...]                      # (Cout, K*K*Cin), tiny
    b = b_ref[...]                      # (Cout, 1) f32

    n_chunks = -(-M // TM)              # static Python int
    for ci in range(n_chunks):          # statically unrolled spatial chunks
        m0 = ci * TM
        mlen = min(TM, M - m0)

        # Build the im2col operand in VMEM: row block t = kh*K + kw holds the Cin
        # channels of tap (kh, kw), i.e. the input shifted by kh*Wp + kw along
        # the flattened spatial (lane) axis.  Ref-window loads, no full-image
        # value materialization.
        for t in range(K * K):
            kh, kw = t // K, t % K
            off = kh * Wp + kw
            patch_ref[t * Cin:(t + 1) * Cin, :mlen] = (
                x_ref[0, :, m0 + off:m0 + off + mlen])

        # Single folded matmul (contraction depth K*K*Cin), f32 accumulation.
        acc = jnp.dot(w, patch_ref[:, :mlen],
                      preferred_element_type=jnp.float32)     # (Cout, mlen) f32
        acc = acc + b                                          # lane-broadcast bias
        if use_activation:
            # ELU(alpha=1): x if x > 0 else exp(x) - 1; clamp the exp argument so
            # the discarded branch never overflows for large positives.
            acc = jnp.where(acc > 0.0, acc,
                            jnp.exp(jnp.minimum(acc, 0.0)) - 1.0)
        o_ref[0, :, m0:m0 + mlen] = acc.astype(o_ref.dtype)


def conv_block_forward(x_nchw, weight, bias, *, use_activation=True,
                       compute_dtype=jnp.bfloat16, out_dtype=jnp.float32,
                       spatial_chunk=512):
    """Equivalent of ConvBlock.forward (reflection pad -> KxK conv -> ELU).

    x_nchw: (N, Cin, H, W) f32; weight: (Cout, Cin, K, K) f32 (OIHW); bias: (Cout,).
    Returns (N, Cout, H, W) in `out_dtype` (pass bf16 to skip the final cast).
    """
    N, Cin, H, W = x_nchw.shape
    Cout, Cin_w, K, K2 = weight.shape
    assert Cin == Cin_w and K == K2 and K % 2 == 1, "stride-1 'same' conv expected"
    p = (K - 1) // 2
    Hp, Wp = H + 2 * p, W + 2 * p

    # --- wrapper glue (no layout transposes; activations stay channel-major) ---
    x = jnp.pad(x_nchw, ((0, 0), (0, 0), (p, p), (p, p)), mode="reflect")
    x = x.reshape(N, Cin, Hp * Wp)
    # K-1 trailing zero taps keep the last in-kernel tap window in bounds.  With
    # stride=1 and 2p == K-1 those taps only ever feed the junk columns (w >= W)
    # that are sliced off below -- do NOT change K/padding without revisiting.
    x = jnp.pad(x, ((0, 0), (0, 0), (0, K - 1))).astype(compute_dtype)
    S = Hp * Wp + (K - 1)
    M = H * Wp                                  # output positions incl. junk cols
    KKC = K * K * Cin

    # OIHW -> (Cout, K*K*Cin), tap-major, matching the kernel's patch row order.
    w = jnp.transpose(weight, (0, 2, 3, 1)).reshape(Cout, KKC).astype(compute_dtype)
    b = bias.reshape(Cout, 1).astype(jnp.float32)

    TM = int(min(spatial_chunk, M))

    kernel = functools.partial(_conv_block_kernel, K=K, Wp=Wp, Cin=Cin, M=M,
                               TM=TM, use_activation=use_activation)
    out = pl.pallas_call(
        kernel,
        out_shape=jax.ShapeDtypeStruct((N, Cout, M), compute_dtype),
        grid_spec=pltpu.PrefetchScalarGridSpec(
            num_scalar_prefetch=0,
            grid=(N,),
            in_specs=[
                pl.BlockSpec((1, Cin, S), lambda n: (n, 0, 0)),
                pl.BlockSpec((Cout, KKC), lambda n: (0, 0)),
                pl.BlockSpec((Cout, 1), lambda n: (0, 0)),
            ],
            out_specs=pl.BlockSpec((1, Cout, M), lambda n: (n, 0, 0)),
            scratch_shapes=[pltpu.VMEM((KKC, TM), compute_dtype)],
        ),
        compiler_params=pltpu.CompilerParams(
            dimension_semantics=("parallel",)),
    )(x, w, b)

    # Drop junk width columns (w >= W); already channel-major, so no transpose.
    out = out.reshape(N, Cout, H, Wp)[:, :, :, :W]
    return out.astype(out_dtype)


def _reference_forward(x_nchw, weight, bias, *, use_activation=True):
    """Pure-JAX reference (reflection pad -> conv -> ELU) for verification."""
    K = weight.shape[-1]
    p = (K - 1) // 2
    x_pad = jnp.pad(x_nchw, ((0, 0), (0, 0), (p, p), (p, p)), mode="reflect")
    out = jax.lax.conv_general_dilated(
        x_pad, weight, window_strides=(1, 1), padding="VALID",
        dimension_numbers=("NCHW", "OIHW", "NCHW"),
        precision=jax.lax.Precision.HIGHEST)
    out = out + bias[None, :, None, None]
    if use_activation:
        out = jnp.where(out > 0.0, out, jnp.expm1(out))
    return out


if __name__ == "__main__":
    # Deterministic parameter init mirroring the module's __init__:
    #   nn.Conv2d(inplanes, outplanes, kernel_size=3, stride=1)
    #   kaiming_normal_(weight) -> std = sqrt(2 / fan_in), fan_in = Cin*K*K
    #   constant_(bias, 0.1)
    inplanes, outplanes, ksize = 4, 8, 3
    N, H, W = 2, 16, 16

    key = jax.random.PRNGKey(0)
    k_x, k_w = jax.random.split(key)

    fan_in = inplanes * ksize * ksize
    weight = (jax.random.normal(k_w, (outplanes, inplanes, ksize, ksize), jnp.float32)
              * jnp.sqrt(2.0 / fan_in))
    bias = jnp.full((outplanes,), 0.1, dtype=jnp.float32)
    x = jax.random.normal(k_x, (N, inplanes, H, W), jnp.float32)

    out = jax.block_until_ready(
        conv_block_forward(x, weight, bias, use_activation=True))
    assert out.shape == (N, outplanes, H, W), out.shape
    assert bool(jnp.all(jnp.isfinite(out)))

    # Tight check: reference fed the same bf16-rounded operands (validates the
    # pad / tap-fold / weight-layout / bias / ELU math of the kernel itself);
    # tolerance also covers the kernel's bf16 output rounding.
    x_b = x.astype(jnp.bfloat16).astype(jnp.float32)
    w_b = weight.astype(jnp.bfloat16).astype(jnp.float32)
    ref_b = _reference_forward(x_b, w_b, bias, use_activation=True)
    assert jnp.allclose(out, ref_b, atol=3e-2, rtol=3e-2), (
        float(jnp.max(jnp.abs(out - ref_b))))

    # Loose sanity check vs full-f32 reference (difference = intentional bf16
    # rounding of the matmul operands and of the stored output).
    ref = _reference_forward(x, weight, bias, use_activation=True)
    assert jnp.allclose(out, ref, atol=1e-1, rtol=1e-1), (
        float(jnp.max(jnp.abs(out - ref))))

    print("KERNEL_OK")
</pallas_src>

<mosaic_0001>
module attributes {stable_mosaic.version = 11 : i64} {
  func.func @_conv_block_kernel(%arg0: i32, %arg1: memref<1x4x326xbf16, #tpu.memory_space<vmem>>, %arg2: memref<8x36xbf16, #tpu.memory_space<vmem>>, %arg3: memref<8x1xf32, #tpu.memory_space<vmem>>, %arg4: memref<1x8x288xbf16, #tpu.memory_space<vmem>>, %arg5: memref<36x288xbf16, #tpu.memory_space<vmem>>) attributes {dimension_semantics = [#tpu.dimension_semantics<parallel>], iteration_bounds = array<i64: 2>, scalar_prefetch = 0 : i64, scratch_operands = 1 : i64, tpu.core_type = #tpu.core_type<tc>, window_params = [{transform_indices = @transform_0, window_bounds = array<i64: 1, 4, 326>}, {pipeline_mode = #tpu.pipeline_mode<synchronous>, transform_indices = @transform_1, window_bounds = array<i64: 8, 36>}, {pipeline_mode = #tpu.pipeline_mode<synchronous>, transform_indices = @transform_2, window_bounds = array<i64: 8, 1>}, {transform_indices = @transform_3, window_bounds = array<i64: 1, 8, 288>}]} {
    %c0 = arith.constant 0 : index
    %c0_0 = arith.constant 0 : index
    %0 = vector.load %arg2[%c0, %c0_0] : memref<8x36xbf16, #tpu.memory_space<vmem>>, vector<8x36xbf16>
    %c0_1 = arith.constant 0 : index
    %c0_2 = arith.constant 0 : index
    %1 = vector.load %arg3[%c0_1, %c0_2] : memref<8x1xf32, #tpu.memory_space<vmem>>, vector<8x1xf32>
    %c0_3 = arith.constant 0 : index
    %c0_4 = arith.constant 0 : index
    %c0_5 = arith.constant 0 : index
    %2 = vector.load %arg1[%c0_3, %c0_4, %c0_5] : memref<1x4x326xbf16, #tpu.memory_space<vmem>>, vector<1x4x288xbf16>
    %3 = vector.shape_cast %2 : vector<1x4x288xbf16> to vector<4x288xbf16>
    %c0_6 = arith.constant 0 : index
    %c0_7 = arith.constant 0 : index
    %4 = vector.load %arg5[%c0_6, %c0_7] : memref<36x288xbf16, #tpu.memory_space<vmem>>, vector<4x288xbf16>
    tpu.vector_store %arg5[%c0_6, %c0_7], %3 {strides = array<i32>} : memref<36x288xbf16, #tpu.memory_space<vmem>>, vector<4x288xbf16>,
    %c0_8 = arith.constant 0 : index
    %c0_9 = arith.constant 0 : index
    %c1 = arith.constant 1 : index
    %5 = vector.load %arg1[%c0_8, %c0_9, %c1] : memref<1x4x326xbf16, #tpu.memory_space<vmem>>, vector<1x4x288xbf16>
    %6 = vector.shape_cast %5 : vector<1x4x288xbf16> to vector<4x288xbf16>
    %c4 = arith.constant 4 : index
    %c0_10 = arith.constant 0 : index
    %7 = vector.load %arg5[%c4, %c0_10] : memref<36x288xbf16, #tpu.memory_space<vmem>>, vector<4x288xbf16>
    tpu.vector_store %arg5[%c4, %c0_10], %6 {strides = array<i32>} : memref<36x288xbf16, #tpu.memory_space<vmem>>, vector<4x288xbf16>,
    %c0_11 = arith.constant 0 : index
    %c0_12 = arith.constant 0 : index
    %c2 = arith.constant 2 : index
    %8 = vector.load %arg1[%c0_11, %c0_12, %c2] : memref<1x4x326xbf16, #tpu.memory_space<vmem>>, vector<1x4x288xbf16>
    %9 = vector.shape_cast %8 : vector<1x4x288xbf16> to vector<4x288xbf16>
    %c8 = arith.constant 8 : index
    %c0_13 = arith.constant 0 : index
    %10 = vector.load %arg5[%c8, %c0_13] : memref<36x288xbf16, #tpu.memory_space<vmem>>, vector<4x288xbf16>
    tpu.vector_store %arg5[%c8, %c0_13], %9 {strides = array<i32>} : memref<36x288xbf16, #tpu.memory_space<vmem>>, vector<4x288xbf16>,
    %c0_14 = arith.constant 0 : index
    %c0_15 = arith.constant 0 : index
    %c18 = arith.constant 18 : index
    %11 = vector.load %arg1[%c0_14, %c0_15, %c18] : memref<1x4x326xbf16, #tpu.memory_space<vmem>>, vector<1x4x288xbf16>
    %12 = vector.shape_cast %11 : vector<1x4x288xbf16> to vector<4x288xbf16>
    %c12 = arith.constant 12 : index
    %c0_16 = arith.constant 0 : index
    %13 = vector.load %arg5[%c12, %c0_16] : memref<36x288xbf16, #tpu.memory_space<vmem>>, vector<4x288xbf16>
    tpu.vector_store %arg5[%c12, %c0_16], %12 {strides = array<i32>} : memref<36x288xbf16, #tpu.memory_space<vmem>>, vector<4x288xbf16>,
    %c0_17 = arith.constant 0 : index
    %c0_18 = arith.constant 0 : index
    %c19 = arith.constant 19 : index
    %14 = vector.load %arg1[%c0_17, %c0_18, %c19] : memref<1x4x326xbf16, #tpu.memory_space<vmem>>, vector<1x4x288xbf16>
    %15 = vector.shape_cast %14 : vector<1x4x288xbf16> to vector<4x288xbf16>
    %c16 = arith.constant 16 : index
    %c0_19 = arith.constant 0 : index
    %16 = vector.load %arg5[%c16, %c0_19] : memref<36x288xbf16, #tpu.memory_space<vmem>>, vector<4x288xbf16>
    tpu.vector_store %arg5[%c16, %c0_19], %15 {strides = array<i32>} : memref<36x288xbf16, #tpu.memory_space<vmem>>, vector<4x288xbf16>,
    %c0_20 = arith.constant 0 : index
    %c0_21 = arith.constant 0 : index
    %c20 = arith.constant 20 : index
    %17 = vector.load %arg1[%c0_20, %c0_21, %c20] : memref<1x4x326xbf16, #tpu.memory_space<vmem>>, vector<1x4x288xbf16>
    %18 = vector.shape_cast %17 : vector<1x4x288xbf16> to vector<4x288xbf16>
    %c20_22 = arith.constant 20 : index
    %c0_23 = arith.constant 0 : index
    %19 = vector.load %arg5[%c20_22, %c0_23] : memref<36x288xbf16, #tpu.memory_space<vmem>>, vector<4x288xbf16>
    tpu.vector_store %arg5[%c20_22, %c0_23], %18 {strides = array<i32>} : memref<36x288xbf16, #tpu.memory_space<vmem>>, vector<4x288xbf16>,
    %c0_24 = arith.constant 0 : index
    %c0_25 = arith.constant 0 : index
    %c36 = arith.constant 36 : index
    %20 = vector.load %arg1[%c0_24, %c0_25, %c36] : memref<1x4x326xbf16, #tpu.memory_space<vmem>>, vector<1x4x288xbf16>
    %21 = vector.shape_cast %20 : vector<1x4x288xbf16> to vector<4x288xbf16>
    %c24 = arith.constant 24 : index
    %c0_26 = arith.constant 0 : index
    %22 = vector.load %arg5[%c24, %c0_26] : memref<36x288xbf16, #tpu.memory_space<vmem>>, vector<4x288xbf16>
    tpu.vector_store %arg5[%c24, %c0_26], %21 {strides = array<i32>} : memref<36x288xbf16, #tpu.memory_space<vmem>>, vector<4x288xbf16>,
    %c0_27 = arith.constant 0 : index
    %c0_28 = arith.constant 0 : index
    %c37 = arith.constant 37 : index
    %23 = vector.load %arg1[%c0_27, %c0_28, %c37] : memref<1x4x326xbf16, #tpu.memory_space<vmem>>, vector<1x4x288xbf16>
    %24 = vector.shape_cast %23 : vector<1x4x288xbf16> to vector<4x288xbf16>
    %c28 = arith.constant 28 : index
    %c0_29 = arith.constant 0 : index
    %25 = vector.load %arg5[%c28, %c0_29] : memref<36x288xbf16, #tpu.memory_space<vmem>>, vector<4x288xbf16>
    tpu.vector_store %arg5[%c28, %c0_29], %24 {strides = array<i32>} : memref<36x288xbf16, #tpu.memory_space<vmem>>, vector<4x288xbf16>,
    %c0_30 = arith.constant 0 : index
    %c0_31 = arith.constant 0 : index
    %c38 = arith.constant 38 : index
    %26 = vector.load %arg1[%c0_30, %c0_31, %c38] : memref<1x4x326xbf16, #tpu.memory_space<vmem>>, vector<1x4x288xbf16>
    %27 = vector.shape_cast %26 : vector<1x4x288xbf16> to vector<4x288xbf16>
    %c32 = arith.constant 32 : index
    %c0_32 = arith.constant 0 : index
    %28 = vector.load %arg5[%c32, %c0_32] : memref<36x288xbf16, #tpu.memory_space<vmem>>, vector<4x288xbf16>
    tpu.vector_store %arg5[%c32, %c0_32], %27 {strides = array<i32>} : memref<36x288xbf16, #tpu.memory_space<vmem>>, vector<4x288xbf16>,
    %c0_33 = arith.constant 0 : index
    %c0_34 = arith.constant 0 : index
    %29 = vector.load %arg5[%c0_33, %c0_34] : memref<36x288xbf16, #tpu.memory_space<vmem>>, vector<36x288xbf16>
    %cst = arith.constant dense<0.000000e+00> : vector<8x288xf32>
    %30 = tpu.matmul %0, %29, %cst {dimension_numbers = #tpu.dot_dimension_numbers<[1], [0], [0], [1], [0, 0, 1, 1], [], []>} : vector<8x36xbf16>, vector<36x288xbf16>, vector<8x288xf32> -> vector<8x288xf32>
    %31 = vector.broadcast %1 : vector<8x1xf32> to vector<8x288xf32>
    %32 = arith.addf %30, %31 : vector<8x288xf32>
    %cst_35 = arith.constant 0.000000e+00 : f32
    %33 = vector.broadcast %cst_35 : f32 to vector<8x288xf32>
    %34 = arith.cmpf ogt, %32, %33 : vector<8x288xf32>
    %cst_36 = arith.constant 0.000000e+00 : f32
    %35 = vector.broadcast %cst_36 : f32 to vector<8x288xf32>
    %36 = arith.minimumf %32, %35 : vector<8x288xf32>
    %37 = math.exp %36 : vector<8x288xf32>
    %cst_37 = arith.constant 1.000000e+00 : f32
    %38 = vector.broadcast %cst_37 : f32 to vector<8x288xf32>
    %39 = arith.subf %37, %38 : vector<8x288xf32>
    %40 = arith.select %34, %32, %39 : vector<8x288xi1>, vector<8x288xf32>
    %41 = arith.truncf %40 : vector<8x288xf32> to vector<8x288xbf16>
    %c0_38 = arith.constant 0 : index
    %c0_39 = arith.constant 0 : index
    %c0_40 = arith.constant 0 : index
    %42 = vector.load %arg4[%c0_38, %c0_39, %c0_40] : memref<1x8x288xbf16, #tpu.memory_space<vmem>>, vector<1x8x288xbf16>
    %43 = vector.shape_cast %42 : vector<1x8x288xbf16> to vector<8x288xbf16>
    %44 = vector.shape_cast %41 : vector<8x288xbf16> to vector<1x8x288xbf16>
    tpu.vector_store %arg4[%c0_38, %c0_39, %c0_40], %44 {strides = array<i32>} : memref<1x8x288xbf16, #tpu.memory_space<vmem>>, vector<1x8x288xbf16>,
    return
  }
  func.func @transform_0(%arg0: i32) -> (i32, i32, i32) {
    %c0_i32 = arith.constant 0 : i32
    %c0_i32_0 = arith.constant 0 : i32
    %c0_i32_1 = arith.constant 0 : i32
    return %arg0, %c0_i32, %c0_i32_0 : i32, i32, i32
  }
  func.func @transform_1(%arg0: i32) -> (i32, i32) {
    %c0_i32 = arith.constant 0 : i32
    %c0_i32_0 = arith.constant 0 : i32
    %c0_i32_1 = arith.constant 0 : i32
    return %c0_i32, %c0_i32_0 : i32, i32
  }
  func.func @transform_2(%arg0: i32) -> (i32, i32) {
    %c0_i32 = arith.constant 0 : i32
    %c0_i32_0 = arith.constant 0 : i32
    %c0_i32_1 = arith.constant 0 : i32
    return %c0_i32, %c0_i32_0 : i32, i32
  }
  func.func @transform_3(%arg0: i32) -> (i32, i32, i32) {
    %c0_i32 = arith.constant 0 : i32
    %c0_i32_0 = arith.constant 0 : i32
    %c0_i32_1 = arith.constant 0 : i32
    return %arg0, %c0_i32, %c0_i32_0 : i32, i32, i32
  }
}

</mosaic_0001>

<bundles_post_ra>
// kernel: tpu_custom_call.1
= control target key start
LH: loop header
LB: loop body
LE: loop exit
PB: predicated region body
PF: predicated region fallthrough
CT: control target
= control target key end

     0   :  { %8 = vsyncpa [#allocation4], 0  ;;  %s1199_s0 = inlined_call_operand.hbm [shape: bf16[2,4,326], index: 0, kind: input, shape index: {}]   ;;  %s1200_s1 = inlined_call_operand.vmem [shape: bf16[8,36], index: 1, kind: input, shape index: {}]   ;;  %s1201_s2 = inlined_call_operand.vmem [shape: f32[8,1], index: 2, kind: input, shape index: {}]   ;;  %s1202_s3 = inlined_call_operand.hbm [shape: bf16[2,8,288], index: 3, kind: output, shape index: {}]  }
   0x1   :  { %10 = vsyncpa [#allocation4 + $0x1], 0 }
   0x2   :  { %11 = vsyncpa [#allocation5], 0 }
   0x3   :  { %13 = vsyncpa [#allocation5 + $0x1], 0  ;;  %s986_s12 = smov 0   ;;  %s988_s13 = smov 0  }
   0x4   :  { %s990_s14 = smov 0   ;;  %s992_s15 = smov 0  }
   0x5 LB: > { %s1007_s16 = sadd.s32 4294967295, %s950_s15   ;;  %s723_s17 = sadd.s32 4294967294, %s950_s15   ;;  %s950_s15 = sphi %s992_s15, %s1216_s15   ;;  %s946_s14 = sphi %s990_s14, %s1215_s14   ;;  %s942_s13 = sphi %s988_s13, %s1214_s13   ;;  %s938_s12 = sphi %s986_s12, %s1213_s12  }
   0x6   : > { %s1011_s18 = sadd.s32 1, %s950_s15   ;;  %s26_s19 = sadd.s32 1, %s946_s14 }
   0x7   : > { %s23_s20 = ssub.s32 %s950_s15, %s1011_s18  ;;  %p33_p0 = scmp.ne.s32.totalorder %s946_s14, %s942_s13 }
   0x8   : > { %p24_p1 = scmp.eq.s32.totalorder %s23_s20, 0  ;;  %p34_p2 = scmp.eq.s32.totalorder %s950_s15, 0 }
   0x9   : > { %p39_p3 = scmp.ne.s32.totalorder %s942_s13, %s938_s12  ;;  %p40_p4 = scmp.eq.s32.totalorder %s1007_s16, 0 }
   0xa   : > { %s1023_s21 = scalar_select %p24_p1, %s946_s14, %s26_s19  }
   0xb   : > { %p35_p5 = por %p34_p2, %p33_p0  ;;  %p1025_p6 = por %p40_p4, %p39_p3 }
   0xc   : > { %p105_p7 = scmp.eq.s32.totalorder %s1007_s16, 1  ;;  %p111_p8 = scmp.eq.s32.totalorder %s723_s17, 1 }
   0xd   : > { %p782_p10 = scmp.lt.s32.totalorder %s950_s15, 2  ;;  %s137_s25 = sand.u32 1, %s946_s14  }
   0xe   : > { %p1032_p11 = por %p105_p7, %p33_p0  ;;  %p1036_p12 = por %p111_p8, %p39_p3 }
   0xf   : > { %s766_s26 = smul.u32 96, %s950_s15  ;;  %p1047_p13 = pnand %p782_p10, %p35_p5 }
  0x10   : > { %s1205_s23 = scalar_select %p1032_p11, 1, 0 }
  0x11   : > { %s1206_s24 = scalar_select %p1036_p12, 1, 0 }
  0x12   : > { %s765_s27 = smul.u32 6, %s137_s25  ;;  %s1045_s30 = scalar_lea.hbm %s1199_s0, %s766_s26 }
  0x13   : > { %s138_s7 = scalar_lea.sflag [#allocation4], %s137_s25  ;;  %s854_s8 = scalar_lea.hbm %s1045_s30, 96 }
  0x14   : > { %s141_s5 = scalar_lea.vmem [#allocation3], %s765_s27  ;;  %p855_p2 = scmp.ne.s32.totalorder %s1045_s30, %s854_s8 }
  0x15   : > { %s149_s6 = sshll.u32 %s141_s5, 4  ;;  %p856_p3 = pneg %p1047_p13  ;;  %s1052_s6 = int_to_ptr.vmem [resolvable:$true] %s149_s6 }
  0x16   : > { %s859_s11 = scalar_lea.hbm %s1199_s0, 192  ;;  %p860_p7 = scmp.lt.u32.totalorder %s1045_s30, %s1199_s0 }
  0x17   : > { %p857_p4 = pnand %p856_p3, %p855_p2  ;;  %p861_p8 = scmp.lt.u32.totalorder %s859_s11, %s854_s8 }
  0x18   : > { %p863_p9 = scmp.lt.u32.totalorder %s854_s8, %s1045_s30 }
  0x19   : > { %p858_p5 = pneg %p857_p4  ;;  %p862_p10 = por %p861_p8, %p860_p7 }
  0x1b   : > { %p864_p0 = por %p863_p9, %p862_p10 }
  0x1d   : > { %p865_p1 = pnand %p864_p0, %p858_p5 }
  0x1f   : > { %868 = shalt.err (!%p865_p1)
}
  0x20   : > { %s869_s20 = scalar_lea.vmem %s1052_s6, 96  ;;  %s952_s25 = smov [#allocation3]  }
  0x21   : > { %p870_p2 = scmp.ne.s32.totalorder %s1052_s6, %s869_s20  ;;  %s874_s26 = sshll.u32 %s952_s25, 4  ;;  %s875_s26 = int_to_ptr.vmem [resolvable:$false] %s874_s26 }
  0x22   : > { %s876_s27 = scalar_lea.vmem %s875_s26, 192  ;;  %p877_p11 = scmp.lt.s32.totalorder %s1052_s6, %s875_s26 }
  0x23   : > { %p872_p4 = pnand %p870_p2, %p856_p3  ;;  %p878_p7 = scmp.lt.s32.totalorder %s876_s27, %s869_s20 }
  0x25   : > { %p873_p12 = pneg %p872_p4  ;;  %p879_p8 = por %p878_p7, %p877_p11 }
  0x27   : > { %p880_p9 = pnand %p879_p8, %p873_p12 }
  0x29   : > { %883 = shalt.err (!%p880_p9)
}
  0x2a   : > { %777 = dma.hbm_to_vmem [thread:$0]  (!%p1047_p13), %s1045_s30, 96, %s1052_s6, %s138_s7  }
  0x2b   : > { %p1208_p0 = scmp.lt.s32.totalorder %s950_s15, 3  ;;  %p1209_p1 = scmp.ge.s32.totalorder %s950_s15, 1 }
  0x2d   : > { %p155_p3 = pnand %p1209_p1, %p1208_p0 }
  0x2e   : > { %s1085_s28 = sand.u32 (!%p155_p3), 1, %s942_s13  }
  0x2f   : > { %158 = sbr.rel (%p155_p3) target bundleno = 474 (0x1da), region = 32  ;;  %s161_s5 = scalar_lea.sflag (!%p155_p3), [#allocation4], %s1085_s28 }
  0x30   : > { %s767_s29 = smul.u32 (!%p155_p3), 6, %s1085_s28 }
  0x32   : > { %s1089_s8 = scalar_lea.vmem (!%p155_p3), [#allocation3], %s767_s29 }
  0x36   : > { %929 = dma.done.wait (%p1025_p6), %s161_s5, 96  }
  0x37   : > { %931 = vsyncadd (%p1025_p6), %s161_s5, 4294967200  ;;  %v203_v0 = vlaneseq  ;;  %v953_v1 = vmov 1983009808   ;;  %v244_v6 = vld [vmem:[%s1089_s8] sm:$0x3f]  ;;  %s954_s22 = smov 126  }
  0x38   : > { %v201_v2 = vunpack.c.l.s4 %v953_v1  ;;  %v212_v7 = vld [vmem:[%s1089_s8] sm:$0x3f]  ;;  %v246_v12 = vcombine.high %v244_v6, %v244_v6  ;;  %s955_s30 = smov 127   ;;  %s956_s4 = smov 110   ;;  %vm210_vm0 = vcmask 254976   ;;  %v958_v24 = vmov 0.0  }
  0x39   : > { %v204_v3 = vshrl.u32 %v203_v0, 7  ;;  %v274_v8 = vld [vmem:[%s1089_s8] sm:$0x3f]  ;;  %v214_v14 = vcombine.low %v212_v7, %v212_v7  ;;  %s957_s6 = smov 109   ;;  %755 = vmatprep.subr.bf16.mxu1 %v958_v24  ;;  %s959_s7 = smov 108   ;;  %vm962_vm1 = vmmov 0  }
  0x3a   : > { %v202_v4 = vunpack.c.0.s8 %v201_v2  ;;  %v304_v11 = vld [vmem:[%s1089_s8] sm:$0x3f]  ;;  %v276_v21 = vcombine.low %v274_v8, %v274_v8  ;;  %s960_s9 = smov 92   ;;  %s961_s10 = smov 91   ;;  %761 = vmatprep.mubr.msk.bf16.mxu1 %vm962_vm1, %v958_v24  ;;  %v964_v42 = vmov 0   ;;  %vm242_vm2 = vcmask 257026  }
  0x3b   : > { %v190_v13 = vld [vmem:[%s1089_s8] sm:$0x3f]  ;;  %v306_v17 = vcombine.high %v304_v11, %v304_v11  ;;  %s963_s11 = smov 90   ;;  %555 = vmatprep.mubr.bf16.mxu0 %v964_v42  ;;  %828 = vset.pattern.permute.xlu0 %v964_v42  ;;  %vm235_vm3 = vcmask 1043456   ;;  %vm268_vm4 = vcmask 1031168   ;;  %vm237_vm5 = vcmask 1039360  }
  0x3c   : > { %v1095_v5 = vsub.s32 %v202_v4, %v204_v3  ;;  %728 = vst.sshfl [vmem:[#allocation2] sm:$0xf pattern:$0x76325410] %v190_v13  ;;  %v192_v18 = vcombine.high %v190_v13, %v190_v13  ;;  %v334_v22 = vld [vmem:[%s1089_s8] sm:$0x3f] }
  0x3d   : > { %v336_v27 = vcombine.low %v334_v22, %v334_v22  ;;  %v364_v28 = vld [vmem:[%s1089_s8] sm:$0x3f]  ;;  %vm328_vm6 = vcmask 891904   ;;  %vm298_vm7 = vcmask 900096   ;;  %vm358_vm8 = vcmask 883712   ;;  %s768_s26 = smul.u32 12, %s1085_s28 }
  0x3e   : > { %v253_v9 = vrot.slane %v244_v6, %v1095_v5  ;;  %v228_v10 = vrot.slane %v212_v7, %v1095_v5  ;;  %v290_v15 = vrot.slane %v274_v8, %v1095_v5  ;;  %v313_v16 = vrot.slane %v304_v11, %v1095_v5  ;;  %v394_v32 = vld [vmem:[%s1089_s8] sm:$0x3f]  ;;  %s769_s27 = smul.u32 192, %s1007_s16  ;;  %s639_s16 = scalar_lea.sflag [#allocation5], %s1085_s28 }
  0x3f   : > { %v260_v19 = vrot.slane %v246_v12, %v1095_v5  ;;  %v221_v20 = vrot.slane %v214_v14, %v1095_v5  ;;  %v206_v23 = vrot.slane %v192_v18, %v1095_v5  ;;  %v320_v25 = vrot.slane %v306_v17, %v1095_v5  ;;  %v424_v36 = vld [vmem:[%s1089_s8] sm:$0x3f]  ;;  %s186_s29 = scalar_lea.vmem [#allocation6], %s768_s26  ;;  %p1210_p11 = scmp.ne.s32.totalorder %s1205_s23, 0 }
  0x40   : > { %261 = vrot.lane.b32.xlu1 %v253_v9, %s954_s22  ;;  %231 = vrot.lane.b32.xlu0 %v228_v10, %s955_s30  ;;  %v283_v26 = vrot.slane %v276_v21, %v1095_v5  ;;  %v350_v29 = vrot.slane %v334_v22, %v1095_v5  ;;  %v343_v30 = vrot.slane %v336_v27, %v1095_v5  ;;  %v189_v43 = vld [vmem:[%s1201_s2] sm:$0xff]  ;;  %vm388_vm9 = vcmask 752640   ;;  %s653_s5 = sshll.u32 %s186_s29, 4  ;;  %s1157_s5 = int_to_ptr.vmem [resolvable:$true] %s653_s5 }
  0x41   : > { %211 = vst.msk [vmem:[#allocation2 + $0x8] sm:$0x3] %vm210_vm0, %v206_v23  ;;  %v366_v31 = vcombine.high %v364_v28, %v364_v28  ;;  %v373_v34 = vrot.slane %v364_v28, %v1095_v5  ;;  %v396_v35 = vcombine.low %v394_v32, %v394_v32  ;;  %v410_v37 = vrot.slane %v394_v32, %v1095_v5 }
  0x42   : > { %v426_v39 = vcombine.high %v424_v36, %v424_v36  ;;  %v433_v41 = vrot.slane %v424_v36, %v1095_v5  ;;  %vm418_vm10 = vcmask 744448   ;;  %vm448_vm11 = vcmask 736256  }
  0x43   : > { %v380_v33 = vrot.slane %v366_v31, %v1095_v5  ;;  %v403_v38 = vrot.slane %v396_v35, %v1095_v5  ;;  %vm513_vm12 = vcmask 1041408   ;;  %vm509_vm13 = vcmask 293888  }
  0x44   : > { %293 = vrot.lane.b32.xlu1 %v290_v15, %s956_s4  ;;  %321 = vrot.lane.b32.xlu0 %v313_v16, %s957_s6  ;;  %v440_v40 = vrot.slane %v426_v39, %v1095_v5  ;;  %vm636_vm15 = vcmask 257024  }
  0x48   : > { %263 = vrot.lane.b32.xlu1 %v260_v19, %s954_s22  ;;  %229 = vrot.lane.b32.xlu0 %v221_v20, %s955_s30  ;;  %s1155_s30 = scalar_lea.hbm %s1202_s3, %s769_s27 }
  0x4c   : > { %323 = vrot.lane.b32.xlu1 %v320_v25, %s957_s6  ;;  %291 = vrot.lane.b32.xlu0 %v283_v26, %s956_s4  ;;  %s884_s4 = scalar_lea.vmem %s1157_s5, 192  ;;  %s965_s6 = smov [#allocation6]  }
  0x4d   : > { %p885_p6 = scmp.ne.s32.totalorder %s1157_s5, %s884_s4 }
  0x4f   : > { %p886_p12 = pnand %p885_p6, %p1210_p11 }
  0x50   : > { %353 = vrot.lane.b32.xlu1 %v350_v29, %s959_s7  ;;  %351 = vrot.lane.b32.xlu0 %v343_v30, %s959_s7  ;;  %s888_s7 = sshll.u32 %s965_s6, 4  ;;  %s889_s7 = int_to_ptr.vmem [resolvable:$false] %s888_s7 }
  0x51   : > { %p887_p13 = pneg %p886_p12  ;;  %p891_p5 = scmp.lt.s32.totalorder %s1157_s5, %s889_s7 }
  0x54   : > { %383 = vrot.lane.b32.xlu1 %v380_v33, %s960_s9  ;;  %381 = vrot.lane.b32.xlu0 %v373_v34, %s960_s9  ;;  %s890_s9 = scalar_lea.vmem %s889_s7, 384 }
  0x55   : > { %p892_p10 = scmp.lt.s32.totalorder %s890_s9, %s884_s4 }
  0x57   : > { %p893_p2 = por %p892_p10, %p891_p5 }
  0x58   : > { %413 = vrot.lane.b32.xlu1 %v410_v37, %s961_s10  ;;  %411 = vrot.lane.b32.xlu0 %v403_v38, %s961_s10 }
  0x59   : > { %p894_p4 = pnand %p893_p2, %p887_p13 }
  0x5c   : > { %443 = vrot.lane.b32.xlu1 %v440_v40, %s963_s11  ;;  %441 = vrot.lane.b32.xlu0 %v433_v41, %s963_s11  ;;  %v188_v40 = vld [vmem:[%s1200_s1] sm:$0xf] }
  0x60   : > { %466 = vperm.xlu0 %828, %v189_v43  }
  0xb2   : > { %v262_v44 = vpop.permute.xlu1 %261  ;;  %v232_v45 = vpop.permute.xlu0 %231 }
  0xb3   : > { %243 = vst.msk [vmem:[#allocation2 + $0x8] sm:$0xc] %vm242_vm2, %v232_v45  ;;  %v265_v50 = vrot.slane %v262_v44, 4  ;;  %v234_v51 = vrot.slane %v232_v45, 4 }
  0xb6   : > { %v294_v46 = vpop.permute.xlu1 %293  ;;  %v322_v47 = vpop.permute.xlu0 %321 }
  0xb7   : > { %303 = vst.msk [vmem:[#allocation2 + $0x14] sm:$0xc] %vm242_vm2, %v294_v46  ;;  %v296_v60 = vrot.slane %v294_v46, 4  ;;  %v325_v61 = vrot.slane %v322_v47, 4 }
  0xba   : > { %v264_v48 = vpop.permute.xlu1 %263  ;;  %v230_v49 = vpop.permute.xlu0 %229 }
  0xbb   : > { %v266_v52 = vrot.slane %v264_v48, 4  ;;  %273 = vst.msk [vmem:[#allocation2 + $0x14] sm:$0x3] %vm210_vm0, %v264_v48  ;;  %v233_v53 = vrot.slane %v230_v49, 4 }
  0xbd   : > { %v267_v54 = vsel %vm235_vm3, %v265_v50, %v266_v52  ;;  %v236_v55 = vsel %vm235_vm3, %v233_v53, %v234_v51 }
  0xbe   : > { %v269_v56 = vsel %vm268_vm4, %v262_v44, %v267_v54  ;;  %v238_v57 = vsel %vm237_vm5, %v230_v49, %v236_v55  ;;  %v324_v58 = vpop.permute.xlu1 %323  ;;  %v292_v59 = vpop.permute.xlu0 %291 }
  0xbf   : > { %272 = vst [vmem:[#allocation2 + $0xc] sm:$0x33] %v269_v56  ;;  %241 = vst [vmem:[#allocation2] sm:$0xcc] %v238_v57  ;;  %v326_v62 = vrot.slane %v324_v58, 4  ;;  %v295_v63 = vrot.slane %v292_v59, 4 }
  0xc0   : > { %333 = vst.msk [vmem:[#allocation2 + $0x20] sm:$0x3] %vm210_vm0, %v324_v58 }
  0xc1   : > { %v327_v0 = vsel %vm235_vm3, %v325_v61, %v326_v62  ;;  %v297_v1 = vsel %vm235_vm3, %v295_v63, %v296_v60 }
  0xc2   : > { %v329_v2 = vsel %vm328_vm6, %v322_v47, %v327_v0  ;;  %v299_v3 = vsel %vm298_vm7, %v292_v59, %v297_v1  ;;  %v354_v4 = vpop.permute.xlu1 %353  ;;  %v352_v5 = vpop.permute.xlu0 %351  ;;  %v838_v6 = vld [vmem:[#allocation2 + $0x8] ss:$12 sps:$4 sm:$0xff]  }
  0xc3   : > { %332 = vst [vmem:[#allocation2 + $0x18] sm:$0x33] %v329_v2  ;;  %302 = vst [vmem:[#allocation2 + $0xc] sm:$0xcc] %v299_v3  ;;  %v356_v7 = vrot.slane %v354_v4, 4  ;;  %v355_v8 = vrot.slane %v352_v5, 4  ;;  %756 = vmatpush3.bf16.msra.mxu1 %v838_v6 }
  0xc4   : > { %363 = vst.msk [vmem:[#allocation2 + $0x20] sm:$0xc] %vm242_vm2, %v354_v4  ;;  %757 = vmatprep.subr.bf16.mxu1 %v958_v24 }
  0xc5   : > { %v357_v9 = vsel %vm235_vm3, %v355_v8, %v356_v7 }
  0xc6   : > { %v359_v10 = vsel %vm358_vm8, %v352_v5, %v357_v9  ;;  %v384_v11 = vpop.permute.xlu1 %383  ;;  %v382_v12 = vpop.permute.xlu0 %381  ;;  %v454_v16 = vld [vmem:[#allocation2] sm:$0xff] }
  0xc7   : > { %362 = vst [vmem:[#allocation2 + $0x18] sm:$0xcc] %v359_v10  ;;  %v386_v13 = vrot.slane %v384_v11, 4  ;;  %393 = vst.msk [vmem:[#allocation2 + $0x2c] sm:$0x3] %vm210_vm0, %v384_v11  ;;  %v385_v14 = vrot.slane %v382_v12, 4 }
  0xc9   : > { %v387_v15 = vsel %vm235_vm3, %v385_v14, %v386_v13 }
  0xca   : > { %v389_v17 = vsel %vm388_vm9, %v382_v12, %v387_v15  ;;  %v414_v18 = vpop.permute.xlu1 %413  ;;  %v412_v19 = vpop.permute.xlu0 %411  ;;  %v456_v20 = vld [vmem:[#allocation2 + $0xc] sm:$0xff] }
  0xcb   : > { %v839_v21 = vld [vmem:[#allocation2 + $0x4] ss:$12 sps:$4 sm:$0xff]   ;;  %392 = vst [vmem:[#allocation2 + $0x24] sm:$0x33] %v389_v17  ;;  %v416_v22 = vrot.slane %v414_v18, 4  ;;  %v415_v23 = vrot.slane %v412_v19, 4  ;;  %v729_v25 = vcombine.low %v454_v16, %v456_v20 }
  0xcc   : > { %423 = vst.msk [vmem:[#allocation2 + $0x2c] sm:$0xc] %vm242_vm2, %v414_v18  ;;  %523 = vmatprep.subr.bf16.mxu0 %v839_v21 }
  0xcd   : > { %v417_v26 = vsel %vm235_vm3, %v415_v23, %v416_v22  ;;  %524 = vmatpush1.bf16.msra.mxu0 %v729_v25 }
  0xce   : > { %v419_v27 = vsel %vm418_vm10, %v412_v19, %v417_v26  ;;  %v444_v28 = vpop.permute.xlu1 %443  ;;  %v442_v29 = vpop.permute.xlu0 %441 }
  0xcf   : > { %422 = vst [vmem:[#allocation2 + $0x24] sm:$0xcc] %v419_v27  ;;  %v446_v30 = vrot.slane %v444_v28, 4  ;;  %453 = vst.msk [vmem:[#allocation2 + $0x38] sm:$0x3] %vm210_vm0, %v444_v28  ;;  %v445_v31 = vrot.slane %v442_v29, 4 }
  0xd1   : > { %v447_v32 = vsel %vm235_vm3, %v445_v31, %v446_v30 }
  0xd2   : > { %v449_v33 = vsel %vm448_vm11, %v442_v29, %v447_v32 }
  0xd3   : > { %v841_v34 = vld [vmem:[#allocation2 + $0x20] ss:$12 sps:$4 sm:$0xff]   ;;  %452 = vst [vmem:[#allocation2 + $0x30] sm:$0x33] %v449_v33 }
  0xd4   : > { %758 = vmatpush3.bf16.msra.mxu1 %v841_v34 }
  0xd5   : > { %759 = vmatprep.subr.bf16.mxu1 %v958_v24 }
  0xd6   : > { %v842_v35 = vld [vmem:[#allocation2 + $0x1c] ss:$12 sps:$4 sm:$0xff]   ;;  %v844_v36 = vld [vmem:[#allocation2 + $0x18] ss:$12 sps:$4 sm:$0xff]  }
  0xd7   : > { %v845_v37 = vld [vmem:[#allocation2 + $0x38] ss:$0 sps:$4 sm:$0x33]   ;;  %525 = vmatprep.subr.bf16.mxu0 %v842_v35 }
  0xd8   : > { %526 = vmatpush1.bf16.msra.mxu0 %v844_v36  ;;  %v521_v38 = vsel %vm513_vm12, %v845_v37, 0 }
  0xd9   : > { %760 = vmatpush3.bf16.msra.mxu1 %v521_v38 }
  0xda   : > { %v462_v39 = vld [vmem:[#allocation2 + $0x30] sm:$0x33] }
  0xdb   : > { %v736_v41 = vcombine.high %v462_v39, %v462_v39  ;;  %v735_v42 = vcombine.low %v462_v39, %v462_v39 }
  0xdc   : > { %762 = vmatmul.mubr.msk.bf16.vlgmr.msra.gmra.mrb[0].mxu1 %vm509_vm13, %v188_v40 }
  0xdd   : > { %738 = vmatprep.subr.msk.bf16.mxu0 %vm513_vm12, %v736_v41  ;;  %v515_v43 = vsel %vm513_vm12, %v735_v42, 0 }
  0xde   : > { %528 = vmatpush1.bf16.msra.mxu0 %v515_v43 }
  0xdf   : > { %v467_v24 = vpop.permute.xlu0 %466 }
  0xe1   : > { %739 = vmatmul.mubr.msk.bf16.vlgmr.msra.gmra.mrb[0].mxu0 %vm509_vm13, %v188_v40 }
 0x1af   : > { %v598_v44 = vpop.f32.mrb[0].mxu1 }
 0x1b0   : > { %v599_v45 = vadd.f32 %v598_v44, %v467_v24  ;;  %v763_v46 = vpop.f32.mrb[1].mxu1 }
 0x1b1   : > { %v601_v47 = vpop.f32.mrb[2].mxu1 }
 0x1b2   : > { %v609_v48 = vmin.f32 %v599_v45, 0.0  ;;  %v764_v49 = vpop.f32.mrb[3].mxu1  ;;  %vm606_vm14 = vcmp.gt.f32.partialorder %v599_v45, 0.0 }
 0x1b4   : > { %v557_v50 = vpop.f32.mrb[0].mxu0  ;;  %v614_v51 = vmul.f32 1.442695, %v609_v48 }
 0x1b5   : > { %v558_v52 = vadd.f32 %v557_v50, %v467_v24  ;;  %v559_v53 = vpop.f32.mrb[1].mxu0 }
 0x1b6   : > { %v560_v54 = vadd.f32 %v559_v53, %v467_v24  ;;  %v561_v55 = vpop.f32.mrb[2].mxu0  ;;  %848 = vpow2.f32 %v614_v51 }
 0x1b7   : > { %v607_v56 = vmin.f32 %v558_v52, 0.0  ;;  %v562_v57 = vpop.f32.mrb[3].mxu0  ;;  %vm604_vm0 = vcmp.gt.f32.partialorder %v558_v52, 0.0 }
 0x1b8   : > { %v608_v58 = vmin.f32 %v560_v54, 0.0  ;;  %vm605_vm1 = vcmp.gt.f32.partialorder %v560_v54, 0.0 }
 0x1b9   : > { %v610_v59 = vmul.f32 1.442695, %v607_v56 }
 0x1ba   : > { %v612_v60 = vmul.f32 1.442695, %v608_v58 }
 0x1bb   : > { %850 = vpow2.f32 %v610_v59 }
 0x1bc   : > { %852 = vpow2.f32 %v612_v60 }
 0x1c0   : > { %v849_v61 = vpop.eup %848 }
 0x1c1   : > { %v743_v62 = vadd.f32 -1.0, %v849_v61 }
 0x1c3   : > { %v621_v63 = vsel %vm606_vm14, %v599_v45, %v743_v62 }
 0x1c4   : > { %v750_v1 = vpack.c.bf16 %v621_v63, %v621_v63 }
 0x1c5   : > { %v851_v0 = vpop.eup %850 }
 0x1c6   : > { %v853_v2 = vpop.eup %852  ;;  %v741_v3 = vadd.f32 -1.0, %v851_v0  ;;  %637 = vst.msk [vmem:[%s186_s29 + $0x8] sm:$0xf] %vm636_vm15, %v750_v1 }
 0x1c7   : > { %v742_v4 = vadd.f32 -1.0, %v853_v2 }
 0x1c8   : > { %v619_v5 = vsel %vm604_vm0, %v558_v52, %v741_v3 }
 0x1c9   : > { %v620_v6 = vsel %vm605_vm1, %v560_v54, %v742_v4 }
 0x1ca   : > { %v749_v7 = vpack.c.bf16 %v620_v6, %v619_v5 }
 0x1cc   : > { %635 = vst [vmem:[%s186_s29] sm:$0xff] %v749_v7 }
 0x1cd   : > { %897 = shalt.err (!%p894_p4)
}
 0x1ce   : > { %s898_s28 = scalar_lea.hbm %s1155_s30, 192  ;;  %s902_s17 = scalar_lea.hbm %s1202_s3, 384 }
 0x1cf   : > { %p899_p7 = scmp.ne.s32.totalorder %s1155_s30, %s898_s28  ;;  %p903_p0 = scmp.lt.u32.totalorder %s1155_s30, %s1202_s3 }
 0x1d0   : > { %p904_p1 = scmp.lt.u32.totalorder %s902_s17, %s898_s28  ;;  %p906_p6 = scmp.lt.u32.totalorder %s898_s28, %s1155_s30 }
 0x1d1   : > { %p900_p8 = pnand %p899_p7, %p1210_p11 }
 0x1d2   : > { %p905_p3 = por %p904_p1, %p903_p0 }
 0x1d3   : > { %p901_p9 = pneg %p900_p8 }
 0x1d4   : > { %p907_p12 = por %p906_p6, %p905_p3 }
 0x1d6   : > { %p908_p13 = pnand %p907_p12, %p901_p9 }
 0x1d8   : > { %911 = shalt.err (!%p908_p13)
}
 0x1d9   : > { %772 = dma.vmem_to_hbm [thread:$0]  (%p1210_p11), %s1157_s5, 192, %s1155_s30, %s639_s16  }
 0x1da PF: > { %s665_s25 = sand.u32 1, %s938_s12   ;;  %p1211_p5 = scmp.ne.s32.totalorder %s1206_s24, 0 }
 0x1db   : > { %p1212_p10 = scmp.ge.s32.totalorder %s950_s15, 2  ;;  %s666_s26 = scalar_lea.sflag [#allocation5], %s665_s25 }
 0x1dd   : > { %p779_p2 = pnand %p1212_p10, %p1211_p5 }
 0x1df   : > { %933 = dma.done.wait (!%p779_p2), %s666_s26, 192  }
 0x1e0   : > { %935 = vsyncadd (!%p779_p2), %s666_s26, 4294967104  ;;  %p16_p4 = scmp.ge.s32.totalorder %s1011_s18, 4   ;;  %s1213_s12 = smov %s942_s13 }
 0x1e1   : > { %s1214_s13 = smov %s946_s14  ;;  %s1215_s14 = smov %s1023_s21 }
 0x1e2   : > { %s1216_s15 = smov %s1011_s18  ;;  %18 = sbr.rel (!%p16_p4) target bundleno = 5 (0x5), region = 77 }
 0x1e9   :  { %671 = vsyncpa [#allocation4], 1 }
 0x1ea   :  { %673 = vsyncpa [#allocation4 + $0x1], 1 }
 0x1eb   :  { %674 = vsyncpa [#allocation5], 1 }
 0x1ec   :  { %676 = vsyncpa [#allocation5 + $0x1], 1 }

</bundles_post_ra>
